<compile_context>
chip_gen: v6e
topology: v6e:2x2x1
jax: 0.10.0
libtpu: 0.0.40
codegen_flags: <defaults>
</compile_context>

<pallas_src>
import functools

import jax
import jax.numpy as jnp
from jax.experimental import pallas as pl
from jax.experimental.pallas import tpu as pltpu

_LANE = 128


def _channel_attention_kernel(x_ref, w1_ref, b1_ref, w2_ref, b2_ref, o_ref,
                              sum_acc, max_acc, *, hw, hw_tile, nb):
    # x_ref: (nb, C, hw_tile) ; w1_ref: (C, Cr) ; b1_ref: (1, Cr)
    # w2_ref: (Cr, C)         ; b2_ref: (1, C)  ; o_ref: (1, nb, C)
    # sum_acc / max_acc: (nb, C) f32 scratch, persistent across the spatial axis.
    s = pl.program_id(1)
    last = pl.num_programs(1) - 1

    @pl.when(s == 0)
    def _():
        sum_acc[...] = jnp.zeros_like(sum_acc)
        max_acc[...] = jnp.full_like(max_acc, -jnp.inf)

    # Upcast after the (cheap) DMA; accumulation stays f32 regardless of input dtype.
    x = x_ref[...].astype(jnp.float32)                      # (nb, C, hw_tile)

    def _accumulate(mask_pad):
        if mask_pad:
            # Last spatial tile reaches past HW: neutralize the padded lanes.
            lane = jax.lax.broadcasted_iota(jnp.int32, x.shape, 2)
            valid = (s * hw_tile + lane) < hw
            xs = jnp.where(valid, x, 0.0)
            xm = jnp.where(valid, x, -jnp.inf)
        else:
            xs = x
            xm = x
        sum_acc[...] += jnp.sum(xs, axis=-1)                # (nb, C)
        max_acc[...] = jnp.maximum(max_acc[...], jnp.max(xm, axis=-1))

    if hw % hw_tile == 0:
        _accumulate(False)                                  # no masking needed ever
    else:
        # Steady state is unmasked; mask only on the ragged last tile.
        @pl.when(s < last)
        def _():
            _accumulate(False)

        @pl.when(s == last)
        def _():
            _accumulate(True)

    @pl.when(s == last)
    def _():
        avg = sum_acc[...] * (1.0 / hw)                     # (nb, C)
        mx = max_acc[...]                                   # (nb, C)
        # Fused shared MLP: one fc1/relu/fc2 pass over both pooled blocks.
        pooled = jnp.concatenate([avg, mx], axis=0)         # (2*nb, C)
        h = jnp.dot(pooled, w1_ref[...],
                    preferred_element_type=jnp.float32) + b1_ref[...]
        h = jnp.maximum(h, 0.0)
        y = jnp.dot(h, w2_ref[...],
                    preferred_element_type=jnp.float32) + b2_ref[...]
        out = y[:nb, :] + y[nb:, :]                         # (nb, C)
        o_ref[...] = jax.nn.sigmoid(out).reshape(o_ref.shape).astype(o_ref.dtype)


def _choose_hw_tile(hw, c, itemsize, hw_tile, budget_bytes):
    """Pick/validate the spatial tile (multiple of 128 lanes, or exactly HW)."""
    if hw_tile is None:
        if c * hw * itemsize <= budget_bytes:
            return hw                      # whole spatial extent in one tile
        hw_tile = max(_LANE, (budget_bytes // (c * itemsize)) // _LANE * _LANE)
    else:
        hw_tile = int(hw_tile)
        if hw_tile != hw:
            # Round caller value to a legal lane-multiple (BlockSpec constraint).
            hw_tile = max(_LANE, (hw_tile // _LANE) * _LANE)
    if hw_tile >= hw:
        return hw
    return int(hw_tile)


def _choose_nb(n, per_image_block_bytes, target_block_bytes):
    """Batch NB images per block (~target bytes), NB must divide N."""
    nb_cap = max(1, min(n, target_block_bytes // max(per_image_block_bytes, 1)))
    # Keep at least 2 batch blocks (megacore on v7x) when blocks stay >= 1 MiB.
    if n >= 2 and nb_cap >= n:
        half = n // 2
        if half * per_image_block_bytes >= (1 << 20):
            nb_cap = half
    for d in range(int(nb_cap), 0, -1):
        if n % d == 0:
            return d
    return 1


def channel_attention(x_nchw, w1, b1, w2, b2, *, hw_tile=None,
                      block_budget_bytes=4 << 20):
    """x_nchw: (N, C, H, W) in its native dtype.
    w1: (C, Cr), b1: (Cr,), w2: (Cr, C), b2: (C,).

    Returns the channel attention map with shape (N, C, 1, 1), dtype of x,
    matching the PyTorch module's output.
    """
    N, C, H, W = x_nchw.shape
    Cr = w1.shape[1]
    HW = H * W
    x = x_nchw.reshape(N, C, HW)          # no dtype cast: keep HBM traffic minimal
    itemsize = jnp.dtype(x.dtype).itemsize

    hw_tile = _choose_hw_tile(HW, C, itemsize, hw_tile, block_budget_bytes)
    num_s = int(pl.cdiv(HW, hw_tile))

    per_image_block = C * hw_tile * itemsize
    nb = _choose_nb(N, per_image_block, block_budget_bytes)
    num_n = N // nb
    block_bytes = nb * per_image_block

    kernel = functools.partial(_channel_attention_kernel,
                               hw=HW, hw_tile=hw_tile, nb=nb)

    weight_bytes = (2 * C * Cr + C + Cr) * 4
    # Double-buffered x blocks + weights + accumulators + headroom; stay under
    # v7x's 64 MiB physical VMEM, above v5e's 16 MiB scoped default.
    vmem_limit = int(min(56 << 20,
                         max(32 << 20, 3 * block_bytes + weight_bytes + (4 << 20))))

    cost = pl.CostEstimate(
        flops=2 * N * C * HW + 8 * N * C * Cr,
        transcendentals=N * C,
        bytes_accessed=N * C * HW * itemsize + weight_bytes + N * C * itemsize,
    )

    out = pl.pallas_call(
        kernel,
        out_shape=jax.ShapeDtypeStruct((num_n, nb, C), x.dtype),
        grid_spec=pltpu.PrefetchScalarGridSpec(
            num_scalar_prefetch=0,
            grid=(num_n, num_s),
            in_specs=[
                pl.BlockSpec((nb, C, hw_tile), lambda n, s: (n, 0, s)),
                # Weights / biases: full blocks, constant index -> stay resident.
                pl.BlockSpec((C, Cr), lambda n, s: (0, 0)),
                pl.BlockSpec((1, Cr), lambda n, s: (0, 0)),
                pl.BlockSpec((Cr, C), lambda n, s: (0, 0)),
                pl.BlockSpec((1, C), lambda n, s: (0, 0)),
            ],
            out_specs=pl.BlockSpec((1, nb, C), lambda n, s: (n, 0, 0)),
            scratch_shapes=[
                pltpu.VMEM((nb, C), jnp.float32),   # sum accumulator
                pltpu.VMEM((nb, C), jnp.float32),   # running max
            ],
        ),
        compiler_params=pltpu.CompilerParams(
            dimension_semantics=("parallel", "arbitrary"),
            vmem_limit_bytes=vmem_limit,
        ),
        cost_estimate=cost,
    )(x,
      w1.astype(jnp.float32),
      b1.reshape(1, Cr).astype(jnp.float32),
      w2.astype(jnp.float32),
      b2.reshape(1, C).astype(jnp.float32))

    return out.reshape(N, C, 1, 1)


def _reference(x_nchw, w1, b1, w2, b2):
    # Pure-JAX reference of the PyTorch forward (for verification).
    xf = x_nchw.astype(jnp.float32)
    avg = jnp.mean(xf, axis=(2, 3))        # (N, C)
    mx = jnp.max(xf, axis=(2, 3))          # (N, C)

    def mlp(v):
        h = jnp.maximum(v @ w1 + b1, 0.0)
        return h @ w2 + b2

    out = jax.nn.sigmoid(mlp(avg) + mlp(mx))
    return out.reshape(*out.shape, 1, 1).astype(x_nchw.dtype)


if __name__ == "__main__":
    # Module config: inplanes=32, reduction=16 -> hidden = 2 (matches
    # nn.Conv2d(32, 2, 1) / nn.Conv2d(2, 32, 1) with bias=True).
    C = 32
    reduction = 16
    Cr = C // reduction

    key = jax.random.PRNGKey(0)
    kx, kw1, kb1, kw2, kb2, kx2 = jax.random.split(key, 6)

    # PyTorch 1x1-conv weight (out, in, 1, 1) is stored here as (in, out) for matmul.
    w1 = 0.01 * jax.random.normal(kw1, (C, Cr), dtype=jnp.float32)
    b1 = 0.01 * jax.random.normal(kb1, (Cr,), dtype=jnp.float32)
    w2 = 0.01 * jax.random.normal(kw2, (Cr, C), dtype=jnp.float32)
    b2 = 0.01 * jax.random.normal(kb2, (C,), dtype=jnp.float32)

    # Test 1: even shapes, auto tiling (single spatial tile, batched images).
    N1, H1, W1 = 2, 16, 16
    x1 = jax.random.normal(kx, (N1, C, H1, W1), dtype=jnp.float32)
    out1 = jax.block_until_ready(channel_attention(x1, w1, b1, w2, b2))
    ref1 = _reference(x1, w1, b1, w2, b2)
    assert out1.shape == (N1, C, 1, 1), out1.shape
    assert jnp.allclose(out1, ref1, atol=1e-5, rtol=1e-5), (
        float(jnp.max(jnp.abs(out1 - ref1))))

    # Test 2: ragged spatial extent + explicit hw_tile=128 -> exercises the
    # multi-tile accumulate path and the masked last spatial tile.
    N2, H2, W2 = 3, 10, 13          # HW = 130
    x2 = jax.random.normal(kx2, (N2, C, H2, W2), dtype=jnp.float32)
    out2 = jax.block_until_ready(
        channel_attention(x2, w1, b1, w2, b2, hw_tile=128))
    ref2 = _reference(x2, w1, b1, w2, b2)
    assert out2.shape == (N2, C, 1, 1), out2.shape
    assert jnp.allclose(out2, ref2, atol=1e-5, rtol=1e-5), (
        float(jnp.max(jnp.abs(out2 - ref2))))

    print("KERNEL_OK")
</pallas_src>

<mosaic_0001>
module attributes {stable_mosaic.version = 11 : i64} {
  func.func @_channel_attention_kernel(%arg0: i32, %arg1: i32, %arg2: memref<2x32x256xf32, #tpu.memory_space<vmem>>, %arg3: memref<32x2xf32, #tpu.memory_space<vmem>>, %arg4: memref<1x2xf32, #tpu.memory_space<vmem>>, %arg5: memref<2x32xf32, #tpu.memory_space<vmem>>, %arg6: memref<1x32xf32, #tpu.memory_space<vmem>>, %arg7: memref<1x2x32xf32, #tpu.memory_space<vmem>>, %arg8: memref<2x32xf32, #tpu.memory_space<vmem>>, %arg9: memref<2x32xf32, #tpu.memory_space<vmem>>) attributes {dimension_semantics = [#tpu.dimension_semantics<parallel>, #tpu.dimension_semantics<arbitrary>], iteration_bounds = array<i64: 1, 1>, scalar_prefetch = 0 : i64, scratch_operands = 2 : i64, tpu.core_type = #tpu.core_type<tc>, window_params = [{transform_indices = @transform_0, window_bounds = array<i64: 2, 32, 256>}, {pipeline_mode = #tpu.pipeline_mode<synchronous>, transform_indices = @transform_1, window_bounds = array<i64: 32, 2>}, {pipeline_mode = #tpu.pipeline_mode<synchronous>, transform_indices = @transform_2, window_bounds = array<i64: 1, 2>}, {pipeline_mode = #tpu.pipeline_mode<synchronous>, transform_indices = @transform_3, window_bounds = array<i64: 2, 32>}, {pipeline_mode = #tpu.pipeline_mode<synchronous>, transform_indices = @transform_4, window_bounds = array<i64: 1, 32>}, {transform_indices = @transform_5, window_bounds = array<i64: 1, 2, 32>}]} {
    %c0_i32 = arith.constant 0 : i32
    %0 = arith.cmpi eq, %arg1, %c0_i32 : i32
    %1 = arith.extui %0 : i1 to i32
    %c0_i32_0 = arith.constant 0 : i32
    %2 = arith.cmpi ne, %1, %c0_i32_0 : i32
    scf.if %2 {
      %cst_14 = arith.constant 0.000000e+00 : f32
      %15 = vector.broadcast %cst_14 : f32 to vector<2x32xf32>
      %c0_15 = arith.constant 0 : index
      %c0_16 = arith.constant 0 : index
      %16 = vector.load %arg8[%c0_15, %c0_16] : memref<2x32xf32, #tpu.memory_space<vmem>>, vector<2x32xf32>
      tpu.vector_store %arg8[%c0_15, %c0_16], %15 {strides = array<i32>} : memref<2x32xf32, #tpu.memory_space<vmem>>, vector<2x32xf32>,
      %cst_17 = arith.constant 0xFF800000 : f32
      %17 = vector.broadcast %cst_17 : f32 to vector<2x32xf32>
      %c0_18 = arith.constant 0 : index
      %c0_19 = arith.constant 0 : index
      %18 = vector.load %arg9[%c0_18, %c0_19] : memref<2x32xf32, #tpu.memory_space<vmem>>, vector<2x32xf32>
      tpu.vector_store %arg9[%c0_18, %c0_19], %17 {strides = array<i32>} : memref<2x32xf32, #tpu.memory_space<vmem>>, vector<2x32xf32>,
    } else {
    }
    %c0 = arith.constant 0 : index
    %c0_1 = arith.constant 0 : index
    %c0_2 = arith.constant 0 : index
    %3 = vector.load %arg2[%c0, %c0_1, %c0_2] : memref<2x32x256xf32, #tpu.memory_space<vmem>>, vector<2x32x256xf32>
    %c0_3 = arith.constant 0 : index
    %c0_4 = arith.constant 0 : index
    %4 = vector.load %arg8[%c0_3, %c0_4] : memref<2x32xf32, #tpu.memory_space<vmem>>, vector<2x32xf32>
    %cst = arith.constant dense<0.000000e+00> : vector<2x32xf32>
    %5 = vector.multi_reduction <add>, %3, %cst [2] : vector<2x32x256xf32> to vector<2x32xf32>
    %6 = arith.addf %4, %5 : vector<2x32xf32>
    %c0_5 = arith.constant 0 : index
    %c0_6 = arith.constant 0 : index
    %7 = vector.load %arg8[%c0_5, %c0_6] : memref<2x32xf32, #tpu.memory_space<vmem>>, vector<2x32xf32>
    tpu.vector_store %arg8[%c0_5, %c0_6], %6 {strides = array<i32>} : memref<2x32xf32, #tpu.memory_space<vmem>>, vector<2x32xf32>,
    %c0_7 = arith.constant 0 : index
    %c0_8 = arith.constant 0 : index
    %8 = vector.load %arg9[%c0_7, %c0_8] : memref<2x32xf32, #tpu.memory_space<vmem>>, vector<2x32xf32>
    %cst_9 = arith.constant dense<0xFF800000> : vector<2x32xf32>
    %9 = vector.multi_reduction <maximumf>, %3, %cst_9 [2] : vector<2x32x256xf32> to vector<2x32xf32>
    %10 = arith.maximumf %8, %9 : vector<2x32xf32>
    %c0_10 = arith.constant 0 : index
    %c0_11 = arith.constant 0 : index
    %11 = vector.load %arg9[%c0_10, %c0_11] : memref<2x32xf32, #tpu.memory_space<vmem>>, vector<2x32xf32>
    tpu.vector_store %arg9[%c0_10, %c0_11], %10 {strides = array<i32>} : memref<2x32xf32, #tpu.memory_space<vmem>>, vector<2x32xf32>,
    %c0_i32_12 = arith.constant 0 : i32
    %12 = arith.cmpi eq, %arg1, %c0_i32_12 : i32
    %13 = arith.extui %12 : i1 to i32
    %c0_i32_13 = arith.constant 0 : i32
    %14 = arith.cmpi ne, %13, %c0_i32_13 : i32
    scf.if %14 {
      %c0_14 = arith.constant 0 : index
      %c0_15 = arith.constant 0 : index
      %15 = vector.load %arg8[%c0_14, %c0_15] : memref<2x32xf32, #tpu.memory_space<vmem>>, vector<2x32xf32>
      %cst_16 = arith.constant 3.906250e-03 : f32
      %16 = vector.broadcast %cst_16 : f32 to vector<2x32xf32>
      %17 = arith.mulf %15, %16 : vector<2x32xf32>
      %c0_17 = arith.constant 0 : index
      %c0_18 = arith.constant 0 : index
      %18 = vector.load %arg9[%c0_17, %c0_18] : memref<2x32xf32, #tpu.memory_space<vmem>>, vector<2x32xf32>
      %19 = tpu.concatenate %17, %18 in 0 : vector<2x32xf32>, vector<2x32xf32> -> vector<4x32xf32>
      %c0_19 = arith.constant 0 : index
      %c0_20 = arith.constant 0 : index
      %20 = vector.load %arg3[%c0_19, %c0_20] : memref<32x2xf32, #tpu.memory_space<vmem>>, vector<32x2xf32>
      %cst_21 = arith.constant dense<0.000000e+00> : vector<4x2xf32>
      %21 = tpu.matmul %19, %20, %cst_21 {dimension_numbers = #tpu.dot_dimension_numbers<[1], [0], [0], [1], [0, 0, 1, 1], [], []>} : vector<4x32xf32>, vector<32x2xf32>, vector<4x2xf32> -> vector<4x2xf32>
      %c0_22 = arith.constant 0 : index
      %c0_23 = arith.constant 0 : index
      %22 = vector.load %arg4[%c0_22, %c0_23] : memref<1x2xf32, #tpu.memory_space<vmem>>, vector<1x2xf32>
      %23 = vector.broadcast %22 : vector<1x2xf32> to vector<4x2xf32>
      %24 = arith.addf %21, %23 : vector<4x2xf32>
      %cst_24 = arith.constant 0.000000e+00 : f32
      %25 = vector.broadcast %cst_24 : f32 to vector<4x2xf32>
      %26 = arith.maximumf %24, %25 : vector<4x2xf32>
      %c0_25 = arith.constant 0 : index
      %c0_26 = arith.constant 0 : index
      %27 = vector.load %arg5[%c0_25, %c0_26] : memref<2x32xf32, #tpu.memory_space<vmem>>, vector<2x32xf32>
      %cst_27 = arith.constant dense<0.000000e+00> : vector<4x32xf32>
      %28 = tpu.matmul %26, %27, %cst_27 {dimension_numbers = #tpu.dot_dimension_numbers<[1], [0], [0], [1], [0, 0, 1, 1], [], []>} : vector<4x2xf32>, vector<2x32xf32>, vector<4x32xf32> -> vector<4x32xf32>
      %c0_28 = arith.constant 0 : index
      %c0_29 = arith.constant 0 : index
      %29 = vector.load %arg6[%c0_28, %c0_29] : memref<1x32xf32, #tpu.memory_space<vmem>>, vector<1x32xf32>
      %30 = vector.broadcast %29 : vector<1x32xf32> to vector<4x32xf32>
      %31 = arith.addf %28, %30 : vector<4x32xf32>
      %32 = vector.extract_strided_slice %31 {offsets = [0, 0], sizes = [2, 32], strides = [1, 1]} : vector<4x32xf32> to vector<2x32xf32>
      %33 = vector.extract_strided_slice %31 {offsets = [2, 0], sizes = [2, 32], strides = [1, 1]} : vector<4x32xf32> to vector<2x32xf32>
      %34 = arith.addf %32, %33 : vector<2x32xf32>
      %35 = arith.negf %34 : vector<2x32xf32>
      %36 = math.exp %35 : vector<2x32xf32>
      %cst_30 = arith.constant 1.000000e+00 : f32
      %37 = vector.broadcast %cst_30 : f32 to vector<2x32xf32>
      %38 = arith.addf %37, %36 : vector<2x32xf32>
      %39 = arith.divf %37, %38 : vector<2x32xf32>
      %40 = vector.shape_cast %39 : vector<2x32xf32> to vector<1x2x32xf32>
      %c0_31 = arith.constant 0 : index
      %c0_32 = arith.constant 0 : index
      %c0_33 = arith.constant 0 : index
      %41 = vector.load %arg7[%c0_31, %c0_32, %c0_33] : memref<1x2x32xf32, #tpu.memory_space<vmem>>, vector<1x2x32xf32>
      tpu.vector_store %arg7[%c0_31, %c0_32, %c0_33], %40 {strides = array<i32>} : memref<1x2x32xf32, #tpu.memory_space<vmem>>, vector<1x2x32xf32>,
    } else {
    }
    return
  }
  func.func @transform_0(%arg0: i32, %arg1: i32) -> (i32, i32, i32) {
    %c0_i32 = arith.constant 0 : i32
    %c0_i32_0 = arith.constant 0 : i32
    return %arg0, %c0_i32, %arg1 : i32, i32, i32
  }
  func.func @transform_1(%arg0: i32, %arg1: i32) -> (i32, i32) {
    %c0_i32 = arith.constant 0 : i32
    %c0_i32_0 = arith.constant 0 : i32
    %c0_i32_1 = arith.constant 0 : i32
    return %c0_i32, %c0_i32_0 : i32, i32
  }
  func.func @transform_2(%arg0: i32, %arg1: i32) -> (i32, i32) {
    %c0_i32 = arith.constant 0 : i32
    %c0_i32_0 = arith.constant 0 : i32
    %c0_i32_1 = arith.constant 0 : i32
    return %c0_i32, %c0_i32_0 : i32, i32
  }
  func.func @transform_3(%arg0: i32, %arg1: i32) -> (i32, i32) {
    %c0_i32 = arith.constant 0 : i32
    %c0_i32_0 = arith.constant 0 : i32
    %c0_i32_1 = arith.constant 0 : i32
    return %c0_i32, %c0_i32_0 : i32, i32
  }
  func.func @transform_4(%arg0: i32, %arg1: i32) -> (i32, i32) {
    %c0_i32 = arith.constant 0 : i32
    %c0_i32_0 = arith.constant 0 : i32
    %c0_i32_1 = arith.constant 0 : i32
    return %c0_i32, %c0_i32_0 : i32, i32
  }
  func.func @transform_5(%arg0: i32, %arg1: i32) -> (i32, i32, i32) {
    %c0_i32 = arith.constant 0 : i32
    %c0_i32_0 = arith.constant 0 : i32
    %c0_i32_1 = arith.constant 0 : i32
    return %arg0, %c0_i32, %c0_i32_0 : i32, i32, i32
  }
}

</mosaic_0001>

<bundles_post_ra>
// kernel: tpu_custom_call.1
= control target key start
LH: loop header
LB: loop body
LE: loop exit
PB: predicated region body
PF: predicated region fallthrough
CT: control target
= control target key end

     0   :  { %10 = vsyncpa [#allocation5], 0  ;;  %s593_s0 = inlined_call_operand.hbm [shape: f32[2,32,256], index: 0, kind: input, shape index: {}]   ;;  %s594_s1 = inlined_call_operand.vmem [shape: f32[32,2], index: 1, kind: input, shape index: {}]   ;;  %s595_s2 = inlined_call_operand.vmem [shape: f32[1,2], index: 2, kind: input, shape index: {}]   ;;  %s596_s3 = inlined_call_operand.vmem [shape: f32[2,32], index: 3, kind: input, shape index: {}]   ;;  %s597_s4 = inlined_call_operand.vmem [shape: f32[1,32], index: 4, kind: input, shape index: {}]   ;;  %s598_s5 = inlined_call_operand.hbm [shape: f32[1,2,32], index: 5, kind: output, shape index: {}]  }
   0x1   :  { %11 = vsyncpa [#allocation6], 0  ;;  %s510_s18 = smov [#allocation4]  }
   0x2   :  { %s17_s19 = sshll.u32 %s510_s18, 4  ;;  %s18_s19 = int_to_ptr.vmem [resolvable:$true] %s17_s19 }
   0x3   :  { %s474_s20 = scalar_lea.vmem %s18_s19, 2048  ;;  %p479_p1 = scmp.lt.s32.totalorder %s18_s19, %s18_s19 }
   0x4   :  { %p475_p0 = scmp.ne.s32.totalorder %s18_s19, %s474_s20  ;;  %p480_p2 = scmp.lt.s32.totalorder %s474_s20, %s474_s20 }
   0x6   :  { %p481_p3 = por %p480_p2, %p479_p1 }
   0x8   :  { %p482_p4 = pnand %p481_p3, %p475_p0 }
   0xa   :  { %485 = shalt.err (!%p482_p4)
}
   0xb   :  { %s511_s21 = smov 256   ;;  %s512_s22 = smov 16  }
   0xc   :  { %23 = dma.hbm_to_vmem [thread:$0]  %s593_s0, 2048, %s18_s19, [#allocation5], %s511_s21, %s511_s21, %s512_s22  }
   0xd   :  { %506 = dma.done.wait [#allocation5], 2048  }
   0xe   :  { %507 = vsyncadd [#allocation5], 4294965248  ;;  %v50_v0 = vld [vmem:[#allocation4 + $0x40] sm:$0xff]  ;;  %v51_v1 = vld [vmem:[#allocation4 + $0x48] sm:$0xff]  ;;  %vm39_vm0 = vcmask 254976   ;;  %v513_v32 = vmov 0.0   ;;  %v91_v42 = vlaneseq }
   0xf   :  { %v42_v2 = vld [vmem:[#allocation4] sm:$0xff]  ;;  %v71_v3 = vadd.f32 %v51_v1, %v50_v0  ;;  %v43_v4 = vld [vmem:[#allocation4 + $0x8] sm:$0xff]  ;;  %v52_v5 = vld [vmem:[#allocation4 + $0x50] sm:$0xff]  ;;  %v156_v15 = vmax.f32 %v50_v0, %v51_v1  ;;  %40 = vst.msk [vmem:[#allocation2] sm:$0x3] %vm39_vm0, %v513_v32  ;;  %439 = vmatprep.subr.mxu0 %v513_v32  ;;  %450 = vmatprep.subr.mxu1 %v513_v32  ;;  %v514_v33 = vmov -inf  }
  0x10   :  { %v53_v6 = vld [vmem:[#allocation4 + $0x58] sm:$0xff]  ;;  %v59_v7 = vadd.f32 %v43_v4, %v42_v2  ;;  %v44_v8 = vld [vmem:[#allocation4 + $0x10] sm:$0xff]  ;;  %v144_v13 = vmax.f32 %v42_v2, %v43_v4  ;;  %v54_v16 = vld [vmem:[#allocation4 + $0x60] sm:$0xff]  ;;  %41 = vst.msk [vmem:[#allocation3] sm:$0x3] %vm39_vm0, %v514_v33  ;;  %vm515_vm1 = vmmov 0  }
  0x11   :  { %v45_v9 = vld [vmem:[#allocation4 + $0x18] sm:$0xff]  ;;  %72 = vadd.xlane.f32.xlu1 %v71_v3  ;;  %v74_v10 = vadd.f32 %v53_v6, %v52_v5  ;;  %v159_v14 = vmax.f32 %v52_v5, %v53_v6  ;;  %v55_v17 = vld [vmem:[#allocation4 + $0x68] sm:$0xff]  ;;  %v46_v18 = vld [vmem:[#allocation4 + $0x20] sm:$0xff]  ;;  %447 = vmatprep.mubr.msk.f32.mxu0 %vm515_vm1, %v513_v32  ;;  %v92_v45 = vand.u32 127, %v91_v42  ;;  %v94_v49 = vshrl.u32 %v91_v42, 7 }
  0x12   :  { %60 = vadd.xlane.f32.xlu0 %v59_v7  ;;  %v62_v11 = vadd.f32 %v45_v9, %v44_v8  ;;  %v147_v12 = vmax.f32 %v44_v8, %v45_v9  ;;  %v47_v19 = vld [vmem:[#allocation4 + $0x28] sm:$0xff]  ;;  %v77_v20 = vadd.f32 %v55_v17, %v54_v16  ;;  %v162_v22 = vmax.f32 %v54_v16, %v55_v17  ;;  %v56_v24 = vld [vmem:[#allocation4 + $0x70] sm:$0xff]  ;;  %v57_v25 = vld [vmem:[#allocation4 + $0x78] sm:$0xff] }
  0x13   :  { %v65_v21 = vadd.f32 %v47_v19, %v46_v18  ;;  %v150_v23 = vmax.f32 %v46_v18, %v47_v19  ;;  %v48_v26 = vld [vmem:[#allocation4 + $0x30] sm:$0xff]  ;;  %v49_v27 = vld [vmem:[#allocation4 + $0x38] sm:$0xff]  ;;  %v80_v28 = vadd.f32 %v57_v25, %v56_v24  ;;  %v165_v30 = vmax.f32 %v56_v24, %v57_v25  ;;  %v230_v36 = vld [vmem:[%s594_s1 + $0x8] sm:$0xff]  ;;  %452 = vmatprep.mubr.msk.f32.mxu1 %vm515_vm1, %v513_v32 }
  0x14   :  { %v68_v29 = vadd.f32 %v49_v27, %v48_v26  ;;  %v153_v31 = vmax.f32 %v48_v26, %v49_v27  ;;  %v232_v34 = vld [vmem:[%s594_s1 + $0x18] sm:$0xff]  ;;  %v231_v35 = vld [vmem:[%s594_s1 + $0x10] sm:$0xff]  ;;  %v229_v37 = vld [vmem:[%s594_s1] sm:$0xff]  ;;  %v97_v46 = vadd.s32 4294967288, %v92_v45  ;;  %v104_v50 = vadd.s32 4294967280, %v92_v45 }
  0x15   :  { %75 = vadd.xlane.f32.xlu1 %v74_v10  ;;  %440 = vmatpush3.msra.mxu0 %v232_v34  ;;  %v111_v54 = vadd.s32 4294967272, %v92_v45  ;;  %v95_v55 = vsub.s32 %v92_v45, %v94_v49  ;;  %vm102_vm2 = vcmask 130112   ;;  %vm109_vm3 = vcmask 195712   ;;  %v428_v45 = vld [vmem:[%s597_s4] ss:$0 sm:$0xff] }
  0x16   :  { %63 = vadd.xlane.f32.xlu0 %v62_v11  ;;  %441 = vmatprep.subr.mxu0 %v513_v32  ;;  %v100_v51 = vsub.s32 %v97_v46, %v94_v49  ;;  %v107_v56 = vsub.s32 %v104_v50, %v94_v49  ;;  %vm116_vm4 = vcmask 261312   ;;  %vm137_vm5 = vcmask 1041409   ;;  %v58_v17 = vld [vmem:[#allocation2] sm:$0x3] }
  0x17   :  { %442 = vmatpush3.msra.mxu0 %v231_v35  ;;  %v114_v61 = vsub.s32 %v111_v54, %v94_v49  ;;  %vm227_vm6 = vcmask 1041408   ;;  %vm240_vm7 = vcmask 261120   ;;  %vm323_vm8 = vcmask 15360  }
  0x18   :  { %443 = vmatprep.subr.mxu0 %v513_v32 }
  0x19   :  { %148 = vmax.xlane.f32.xlu1 %v147_v12  ;;  %444 = vmatpush3.msra.mxu0 %v230_v36 }
  0x1a   :  { %145 = vmax.xlane.f32.xlu0 %v144_v13  ;;  %445 = vmatprep.subr.mxu0 %v513_v32 }
  0x1b   :  { %446 = vmatpush3.msra.mxu0 %v229_v37 }
  0x1d   :  { %160 = vmax.xlane.f32.xlu1 %v159_v14 }
  0x1e   :  { %157 = vmax.xlane.f32.xlu0 %v156_v15 }
  0x21   :  { %78 = vadd.xlane.f32.xlu1 %v77_v20 }
  0x22   :  { %66 = vadd.xlane.f32.xlu0 %v65_v21 }
  0x25   :  { %163 = vmax.xlane.f32.xlu1 %v162_v22 }
  0x26   :  { %151 = vmax.xlane.f32.xlu0 %v150_v23 }
  0x29   :  { %81 = vadd.xlane.f32.xlu1 %v80_v28 }
  0x2a   :  { %69 = vadd.xlane.f32.xlu0 %v68_v29 }
  0x2d   :  { %166 = vmax.xlane.f32.xlu1 %v165_v30  ;;  %v143_v30 = vld [vmem:[#allocation3] sm:$0x3] }
  0x2e   :  { %154 = vmax.xlane.f32.xlu0 %v153_v31 }
  0x9a   :  { %v73_v38 = vpop.xlane.xlu1 %72 }
  0x9b   :  { %v61_v39 = vpop.xlane.xlu0 %60  ;;  %v121_v62 = vrot.slane %v73_v38, %v95_v55 }
  0x9c   :  { %v96_v63 = vrot.slane %v61_v39, %v95_v55  ;;  %v315_v39 = vld [vmem:[%s596_s3] sm:$0x3] }
  0x9d   :  { %451 = vmatpush3.msk.msra.mxu1 %vm227_vm6, %v315_v39 }
  0x9e   :  { %v76_v40 = vpop.xlane.xlu1 %75 }
  0x9f   :  { %v64_v41 = vpop.xlane.xlu0 %63  ;;  %v125_v57 = vrot.slane %v76_v40, %v100_v51  ;;  %v426_v40 = vld [vmem:[%s595_s2] ss:$0 sm:$0xff]  ;;  %s516_s2 = smov [#allocation7]  }
  0xa0   :  { %v101_v58 = vrot.slane %v64_v41, %v100_v51  ;;  %s417_s3 = sshll.u32 %s516_s2, 4  ;;  %s418_s3 = int_to_ptr.vmem [resolvable:$true] %s417_s3 }
  0xa1   :  { %v126_v2 = vsel %vm102_vm2, %v125_v57, %v121_v62  ;;  %s486_s12 = scalar_lea.vmem %s418_s3, 32  ;;  %p491_p6 = scmp.lt.s32.totalorder %s418_s3, %s418_s3 }
  0xa2   :  { %v149_v43 = vpop.xlane.xlu1 %148  ;;  %v103_v3 = vsel %vm102_vm2, %v101_v58, %v96_v63  ;;  %p487_p5 = scmp.ne.s32.totalorder %s418_s3, %s486_s12  ;;  %p492_p7 = scmp.lt.s32.totalorder %s486_s12, %s486_s12 }
  0xa3   :  { %v146_v44 = vpop.xlane.xlu0 %145  ;;  %v183_v5 = vrot.slane %v149_v43, %v100_v51 }
  0xa4   :  { %v179_v10 = vrot.slane %v146_v44, %v95_v55  ;;  %p493_p8 = por %p492_p7, %p491_p6 }
  0xa6   :  { %v161_v47 = vpop.xlane.xlu1 %160  ;;  %v184_v24 = vsel %vm102_vm2, %v183_v5, %v179_v10  ;;  %p494_p9 = pnand %p493_p8, %p487_p5 }
  0xa7   :  { %v158_v48 = vpop.xlane.xlu0 %157  ;;  %v202_v6 = vrot.slane %v161_v47, %v100_v51 }
  0xa8   :  { %v198_v7 = vrot.slane %v158_v48, %v95_v55 }
  0xaa   :  { %v79_v52 = vpop.xlane.xlu1 %78  ;;  %v203_v20 = vsel %vm102_vm2, %v202_v6, %v198_v7 }
  0xab   :  { %v67_v53 = vpop.xlane.xlu0 %66  ;;  %v130_v0 = vrot.slane %v79_v52, %v107_v56 }
  0xac   :  { %v108_v1 = vrot.slane %v67_v53, %v107_v56 }
  0xad   :  { %v131_v11 = vsel %vm109_vm3, %v130_v0, %v126_v2 }
  0xae   :  { %v164_v59 = vpop.xlane.xlu1 %163  ;;  %v110_v14 = vsel %vm109_vm3, %v108_v1, %v103_v3 }
  0xaf   :  { %v152_v60 = vpop.xlane.xlu0 %151  ;;  %v207_v12 = vrot.slane %v164_v59, %v107_v56 }
  0xb0   :  { %v188_v15 = vrot.slane %v152_v60, %v107_v56 }
  0xb1   :  { %v208_v25 = vsel %vm109_vm3, %v207_v12, %v203_v20 }
  0xb2   :  { %v82_v4 = vpop.xlane.xlu1 %81  ;;  %v189_v28 = vsel %vm109_vm3, %v188_v15, %v184_v24 }
  0xb3   :  { %v135_v8 = vrot.slane %v82_v4, %v114_v61  ;;  %v70_v9 = vpop.xlane.xlu0 %69 }
  0xb4   :  { %v115_v13 = vrot.slane %v70_v9, %v114_v61 }
  0xb5   :  { %v136_v16 = vsel %vm116_vm4, %v135_v8, %v131_v11 }
  0xb6   :  { %v117_v18 = vsel %vm116_vm4, %v115_v13, %v110_v14  ;;  %v167_v19 = vpop.xlane.xlu1 %166 }
  0xb7   :  { %v138_v21 = vsel %vm137_vm5, %v136_v16, %v117_v18  ;;  %v212_v22 = vrot.slane %v167_v19, %v114_v61  ;;  %v155_v23 = vpop.xlane.xlu0 %154 }
  0xb8   :  { %v140_v26 = vadd.f32 %v138_v21, %v58_v17  ;;  %v193_v27 = vrot.slane %v155_v23, %v114_v61 }
  0xb9   :  { %v213_v29 = vsel %vm116_vm4, %v212_v22, %v208_v25 }
  0xba   :  { %142 = vst.msk [vmem:[#allocation2] sm:$0x3] %vm39_vm0, %v140_v26  ;;  %v194_v31 = vsel %vm116_vm4, %v193_v27, %v189_v28 }
  0xbb   :  { %v214_v32 = vsel %vm137_vm5, %v213_v29, %v194_v31 }
  0xbc   :  { %v216_v33 = vmax.f32 %v143_v30, %v214_v32 }
  0xbe   :  { %217 = vst.msk [vmem:[#allocation3] sm:$0x3] %vm39_vm0, %v216_v33 }
  0xc1   :  { %v221_v34 = vld [vmem:[#allocation2] sm:$0x3] }
  0xc2   :  { %v222_v36 = vmul.f32 0.00390625, %v221_v34 }
  0xc5   :  { %v223_v35 = vld [vmem:[#allocation3] sm:$0x3] }
  0xc6   :  { %v225_v37 = vrot.slane %v223_v35, 6 }
  0xc8   :  { %v228_v38 = vsel %vm227_vm6, %v222_v36, %v225_v37 }
  0xc9   :  { %448 = vmatmul.mubr.msk.f32.vlgmr.msra.gmra.mxu0 %vm240_vm7, %v228_v38 }
 0x189   :  { %v310_v41 = vpop.f32.mrf.mxu0 }
 0x18a   :  { %v311_v42 = vadd.f32 %v426_v40, %v310_v41 }
 0x18b   :  { %v449_v43 = vpop.f32.mrf.mxu0 }
 0x18c   :  { %v314_v44 = vmax.f32 %v311_v42, 0.0 }
 0x18e   :  { %453 = vmatmul.mubr.msk.f32.vlgmr.msra.gmra.mxu1 %vm323_vm8, %v314_v44 }
 0x24e   :  { %v396_v46 = vpop.f32.mrf.mxu1 }
 0x24f   :  { %v397_v47 = vadd.f32 %v428_v45, %v396_v46 }
 0x250   :  { %v454_v48 = vpop.f32.mrf.mxu1 }
 0x251   :  { %v401_v49 = vrot.slane %v397_v47, 2 }
 0x253   :  { %v403_v50 = vadd.f32 %v401_v49, %v397_v47 }
 0x255   :  { %v431_v51 = vmul.f32 -1.442695, %v403_v50 }
 0x257   :  { %462 = vpow2.f32 %v431_v51 }
 0x264   :  { %v463_v52 = vpop.eup %462 }
 0x265   :  { %v407_v53 = vadd.f32 1.0, %v463_v52 }
 0x267   :  { %464 = vrcp.f32 %v407_v53 }
 0x274   :  { %v465_v54 = vpop.eup %464 }
 0x275   :  { %410 = vst.msk [vmem:[#allocation7] sm:$0x3] %vm39_vm0, %v465_v54 }
 0x276   :  { %497 = shalt.err (!%p494_p9)
}
 0x277   :  { %420 = dma.vmem_to_hbm [thread:$0]  %s418_s3, 32, %s598_s5, [#allocation6]  }
 0x278   :  { %508 = dma.done.wait [#allocation6], 32  }
 0x279   :  { %509 = vsyncadd [#allocation6], 4294967264 }
 0x27a   :  { %424 = vsyncpa [#allocation5], 1 }
 0x27b   :  { %425 = vsyncpa [#allocation6], 1 }

</bundles_post_ra>
